<compile_context>
chip_gen: v6e
topology: v6e:2x2x1
jax: 0.10.0
libtpu: 0.0.40
codegen_flags: <defaults>
</compile_context>

<pallas_src>
import jax
import jax.numpy as jnp
from jax.experimental import pallas as pl
from jax.experimental.pallas import tpu as pltpu

LANES = 128
MAX_TILE_ROWS = 2048   # 2048x128 f32 = 1 MiB/tile; 2 in + 1 out, double-buffered ~6 MiB
NUM_CORES = 2          # megacore sharding on v7x; benign extra grid axis on v5e/v6e


def _round_up(x, m):
    return ((x + m - 1) // m) * m


def _make_bce_kernel(n_valid, tile_rows, steps_per_core, needs_mask):
    def kernel(pred_ref, gt_ref, loss_ref, acc_ref):
        c = pl.program_id(0)
        i = pl.program_id(1)

        @pl.when(i == 0)
        def _():
            acc_ref[...] = jnp.zeros_like(acc_ref)

        p = pred_ref[...].astype(jnp.float32)
        g = gt_ref[...].astype(jnp.float32)
        # Keep the general two-log formula (valid for soft labels, matches the module).
        loss = -(g * jnp.log(p + 1e-12) + (1.0 - g) * jnp.log(1.0 - p + 1e-12))

        if needs_mask:
            # Mask the ragged tail exactly (pad elements -> loss == 0).  Pure VPU work,
            # fully hidden under the HBM-bound pipeline.
            base = (c * steps_per_core + i) * (tile_rows * LANES)
            row_iota = jax.lax.broadcasted_iota(jnp.int32, (tile_rows, LANES), 0)
            col_iota = jax.lax.broadcasted_iota(jnp.int32, (tile_rows, LANES), 1)
            flat_idx = base + row_iota * LANES + col_iota
            loss = jnp.where(flat_idx < n_valid, loss, 0.0)

        loss_ref[...] = loss
        # Sublane-aligned partial sums: (T,128) -> (T//8, 8, 128), summed over the
        # leading (vreg-stacked) axis = plain VPU adds; the final cross-lane reduce is
        # deferred to the wrapper (2*8*128 elements -> negligible).
        acc_ref[...] += loss.reshape(tile_rows // 8, 8, LANES).sum(axis=0)

    return kernel


def bce_ohem(pred, gt, top_ratio=0.3, top_weight=1.0):
    """Matches BCE_OHEM.forward(pred, gt, valid_mask=None)."""
    # TODO(synk): valid_mask path needs a data-dependent top-k size (int(mask.sum()*ratio));
    #             only the valid_mask=None path is implemented here.
    n = int(pred.size)
    rows_needed = pl.cdiv(n, LANES)
    tile_rows = min(MAX_TILE_ROWS, _round_up(pl.cdiv(rows_needed, NUM_CORES), 8))
    steps_per_core = pl.cdiv(rows_needed, NUM_CORES * tile_rows)
    rows_per_core = steps_per_core * tile_rows
    total_elems = NUM_CORES * rows_per_core * LANES
    pad = total_elems - n

    # No dtype cast here (kernel casts); pad only when the flat size is ragged.
    flat_p = pred.reshape(-1)
    flat_g = gt.reshape(-1)
    if pad:
        flat_p = jnp.pad(flat_p, (0, pad))
        flat_g = jnp.pad(flat_g, (0, pad))
    p3 = flat_p.reshape(NUM_CORES, rows_per_core, LANES)
    g3 = flat_g.reshape(NUM_CORES, rows_per_core, LANES)

    kernel = _make_bce_kernel(n, tile_rows, steps_per_core, needs_mask=(pad != 0))

    tile_spec = pl.BlockSpec((None, tile_rows, LANES), lambda c, i: (c, i, 0))

    loss_mat, partial = pl.pallas_call(
        kernel,
        out_shape=(
            jax.ShapeDtypeStruct((NUM_CORES, rows_per_core, LANES), jnp.float32),
            jax.ShapeDtypeStruct((NUM_CORES, 8, LANES), jnp.float32),
        ),
        grid_spec=pltpu.PrefetchScalarGridSpec(
            num_scalar_prefetch=0,
            grid=(NUM_CORES, steps_per_core),
            in_specs=[tile_spec, tile_spec],
            out_specs=(
                pl.BlockSpec((None, tile_rows, LANES), lambda c, i: (c, i, 0)),
                # per-core resident partial-sum accumulator (constant along step axis)
                pl.BlockSpec((None, 8, LANES), lambda c, i: (c, 0, 0)),
            ),
        ),
        compiler_params=pltpu.CompilerParams(
            dimension_semantics=("parallel", "arbitrary"),
            vmem_limit_bytes=32 * 1024 * 1024),
        cost_estimate=pl.CostEstimate(
            flops=int(5 * total_elems),
            transcendentals=int(2 * total_elems),
            bytes_accessed=int((pred.dtype.itemsize + gt.dtype.itemsize + 4) * total_elems),
        ),
    )(p3, g3)

    valid_num = n
    topk_num = int(valid_num * top_ratio)
    loss_total = partial.sum() / (valid_num + 1e-12)
    if topk_num == 0:
        return loss_total

    flat_loss = loss_mat.reshape(-1)[:n]
    # TODO(synk): top-k has no clean Pallas sort primitive on TPU; selection via lax.top_k glue.
    topk_vals = jax.lax.top_k(flat_loss, topk_num)[0]
    return loss_total + top_weight * jnp.mean(topk_vals)


def _reference(pred, gt, top_ratio=0.3, top_weight=1.0):
    pred = pred.astype(jnp.float32)
    gt = gt.astype(jnp.float32)
    loss_mat = -(gt * jnp.log(pred + 1e-12) + (1.0 - gt) * jnp.log(1.0 - pred + 1e-12))
    flat = loss_mat.reshape(-1)
    n = flat.shape[0]
    k = int(n * top_ratio)
    total = flat.sum() / (n + 1e-12)
    if k == 0:
        return total
    topk = jax.lax.top_k(flat, k)[0]
    return total + top_weight * jnp.mean(topk)


if __name__ == "__main__":
    key = jax.random.PRNGKey(0)
    k1, k2 = jax.random.split(key)
    # NCHW, small shapes: batch=2, channels=4, spatial=16
    pred = jax.nn.sigmoid(jax.random.normal(k1, (2, 4, 16, 16), dtype=jnp.float32))
    gt = (jax.random.uniform(k2, (2, 4, 16, 16)) > 0.5).astype(jnp.float32)

    out = bce_ohem(pred, gt, top_ratio=0.3, top_weight=1.0)
    out = jax.block_until_ready(out)

    ref = jax.block_until_ready(_reference(pred, gt, top_ratio=0.3, top_weight=1.0))
    assert jnp.allclose(out, ref, rtol=1e-5, atol=1e-6), (out, ref)
    print("KERNEL_OK")
</pallas_src>

<mosaic_0001>
module attributes {stable_mosaic.version = 11 : i64} {
  func.func @kernel(%arg0: i32, %arg1: i32, %arg2: memref<1x8x128xf32, #tpu.memory_space<vmem>>, %arg3: memref<1x8x128xf32, #tpu.memory_space<vmem>>, %arg4: memref<1x8x128xf32, #tpu.memory_space<vmem>>, %arg5: memref<1x8x128xf32, #tpu.memory_space<vmem>>) attributes {dimension_semantics = [#tpu.dimension_semantics<parallel>, #tpu.dimension_semantics<arbitrary>], iteration_bounds = array<i64: 2, 1>, scalar_prefetch = 0 : i64, scratch_operands = 0 : i64, tpu.core_type = #tpu.core_type<tc>, window_params = [{transform_indices = @transform_0, window_bounds = array<i64: 1, 8, 128>}, {transform_indices = @transform_1, window_bounds = array<i64: 1, 8, 128>}, {transform_indices = @transform_2, window_bounds = array<i64: 1, 8, 128>}, {transform_indices = @transform_3, window_bounds = array<i64: 1, 8, 128>}]} {
    %c0_i32 = arith.constant 0 : i32
    %0 = arith.cmpi eq, %arg1, %c0_i32 : i32
    %1 = arith.extui %0 : i1 to i32
    %c0_i32_0 = arith.constant 0 : i32
    %2 = arith.cmpi ne, %1, %c0_i32_0 : i32
    scf.if %2 {
      %cst_20 = arith.constant 0.000000e+00 : f32
      %33 = vector.broadcast %cst_20 : f32 to vector<8x128xf32>
      %c0_21 = arith.constant 0 : index
      %c0_22 = arith.constant 0 : index
      %c0_23 = arith.constant 0 : index
      %34 = vector.load %arg5[%c0_21, %c0_22, %c0_23] : memref<1x8x128xf32, #tpu.memory_space<vmem>>, vector<1x8x128xf32>
      %35 = vector.shape_cast %34 : vector<1x8x128xf32> to vector<8x128xf32>
      %36 = vector.shape_cast %33 : vector<8x128xf32> to vector<1x8x128xf32>
      tpu.vector_store %arg5[%c0_21, %c0_22, %c0_23], %36 {strides = array<i32>} : memref<1x8x128xf32, #tpu.memory_space<vmem>>, vector<1x8x128xf32>,
    } else {
    }
    %c0 = arith.constant 0 : index
    %c0_1 = arith.constant 0 : index
    %c0_2 = arith.constant 0 : index
    %3 = vector.load %arg2[%c0, %c0_1, %c0_2] : memref<1x8x128xf32, #tpu.memory_space<vmem>>, vector<1x8x128xf32>
    %4 = vector.shape_cast %3 : vector<1x8x128xf32> to vector<8x128xf32>
    %c0_3 = arith.constant 0 : index
    %c0_4 = arith.constant 0 : index
    %c0_5 = arith.constant 0 : index
    %5 = vector.load %arg3[%c0_3, %c0_4, %c0_5] : memref<1x8x128xf32, #tpu.memory_space<vmem>>, vector<1x8x128xf32>
    %6 = vector.shape_cast %5 : vector<1x8x128xf32> to vector<8x128xf32>
    %cst = arith.constant 9.99999996E-13 : f32
    %7 = vector.broadcast %cst : f32 to vector<8x128xf32>
    %8 = arith.addf %4, %7 : vector<8x128xf32>
    %9 = math.log %8 : vector<8x128xf32>
    %10 = arith.mulf %6, %9 : vector<8x128xf32>
    %cst_6 = arith.constant 1.000000e+00 : f32
    %11 = vector.broadcast %cst_6 : f32 to vector<8x128xf32>
    %12 = arith.subf %11, %6 : vector<8x128xf32>
    %cst_7 = arith.constant 1.000000e+00 : f32
    %13 = vector.broadcast %cst_7 : f32 to vector<8x128xf32>
    %14 = arith.subf %13, %4 : vector<8x128xf32>
    %cst_8 = arith.constant 9.99999996E-13 : f32
    %15 = vector.broadcast %cst_8 : f32 to vector<8x128xf32>
    %16 = arith.addf %14, %15 : vector<8x128xf32>
    %17 = math.log %16 : vector<8x128xf32>
    %18 = arith.mulf %12, %17 : vector<8x128xf32>
    %19 = arith.addf %10, %18 : vector<8x128xf32>
    %cst_9 = arith.constant 0.000000e+00 : f32
    %20 = vector.broadcast %cst_9 : f32 to vector<8x128xf32>
    %21 = arith.subf %20, %19 : vector<8x128xf32>
    %c0_10 = arith.constant 0 : index
    %c0_11 = arith.constant 0 : index
    %c0_12 = arith.constant 0 : index
    %22 = vector.load %arg4[%c0_10, %c0_11, %c0_12] : memref<1x8x128xf32, #tpu.memory_space<vmem>>, vector<1x8x128xf32>
    %23 = vector.shape_cast %22 : vector<1x8x128xf32> to vector<8x128xf32>
    %24 = vector.shape_cast %21 : vector<8x128xf32> to vector<1x8x128xf32>
    tpu.vector_store %arg4[%c0_10, %c0_11, %c0_12], %24 {strides = array<i32>} : memref<1x8x128xf32, #tpu.memory_space<vmem>>, vector<1x8x128xf32>,
    %c0_13 = arith.constant 0 : index
    %c0_14 = arith.constant 0 : index
    %c0_15 = arith.constant 0 : index
    %25 = vector.load %arg5[%c0_13, %c0_14, %c0_15] : memref<1x8x128xf32, #tpu.memory_space<vmem>>, vector<1x8x128xf32>
    %26 = vector.shape_cast %25 : vector<1x8x128xf32> to vector<8x128xf32>
    %27 = vector.shape_cast %21 : vector<8x128xf32> to vector<1x8x128xf32>
    %cst_16 = arith.constant dense<0.000000e+00> : vector<8x128xf32>
    %28 = vector.multi_reduction <add>, %27, %cst_16 [0] : vector<1x8x128xf32> to vector<8x128xf32>
    %29 = arith.addf %26, %28 : vector<8x128xf32>
    %c0_17 = arith.constant 0 : index
    %c0_18 = arith.constant 0 : index
    %c0_19 = arith.constant 0 : index
    %30 = vector.load %arg5[%c0_17, %c0_18, %c0_19] : memref<1x8x128xf32, #tpu.memory_space<vmem>>, vector<1x8x128xf32>
    %31 = vector.shape_cast %30 : vector<1x8x128xf32> to vector<8x128xf32>
    %32 = vector.shape_cast %29 : vector<8x128xf32> to vector<1x8x128xf32>
    tpu.vector_store %arg5[%c0_17, %c0_18, %c0_19], %32 {strides = array<i32>} : memref<1x8x128xf32, #tpu.memory_space<vmem>>, vector<1x8x128xf32>,
    return
  }
  func.func @transform_0(%arg0: i32, %arg1: i32) -> (i32, i32, i32) {
    %c0_i32 = arith.constant 0 : i32
    %c0_i32_0 = arith.constant 0 : i32
    return %arg0, %arg1, %c0_i32 : i32, i32, i32
  }
  func.func @transform_1(%arg0: i32, %arg1: i32) -> (i32, i32, i32) {
    %c0_i32 = arith.constant 0 : i32
    %c0_i32_0 = arith.constant 0 : i32
    return %arg0, %arg1, %c0_i32 : i32, i32, i32
  }
  func.func @transform_2(%arg0: i32, %arg1: i32) -> (i32, i32, i32) {
    %c0_i32 = arith.constant 0 : i32
    %c0_i32_0 = arith.constant 0 : i32
    return %arg0, %arg1, %c0_i32 : i32, i32, i32
  }
  func.func @transform_3(%arg0: i32, %arg1: i32) -> (i32, i32, i32) {
    %c0_i32 = arith.constant 0 : i32
    %c0_i32_0 = arith.constant 0 : i32
    %c0_i32_1 = arith.constant 0 : i32
    return %arg0, %c0_i32, %c0_i32_0 : i32, i32, i32
  }
}

</mosaic_0001>

<bundles_post_ra>
// kernel: tpu_custom_call.1
= control target key start
LH: loop header
LB: loop body
LE: loop exit
PB: predicated region body
PF: predicated region fallthrough
CT: control target
= control target key end

     0   :  { %9 = vsyncpa [#allocation3], 0  ;;  %s950_s0 = inlined_call_operand.hbm [shape: f32[2,8,128], index: 0, kind: input, shape index: {}]   ;;  %s951_s1 = inlined_call_operand.hbm [shape: f32[2,8,128], index: 1, kind: input, shape index: {}]   ;;  %s952_s2 = inlined_call_operand.hbm [shape: f32[2,8,128], index: 2, kind: output, shape index: {0}]   ;;  %s953_s3 = inlined_call_operand.hbm [shape: f32[2,8,128], index: 3, kind: output, shape index: {1}]  }
   0x1   :  { %11 = vsyncpa [#allocation3 + $0x1], 0 }
   0x2   :  { %12 = vsyncpa [#allocation6], 0 }
   0x3   :  { %14 = vsyncpa [#allocation6 + $0x1], 0 }
   0x4   :  { %15 = vsyncpa [#allocation4], 0 }
   0x5   :  { %17 = vsyncpa [#allocation4 + $0x1], 0 }
   0x6   :  { %18 = vsyncpa [#allocation9], 0 }
   0x7   :  { %20 = vsyncpa [#allocation9 + $0x1], 0  ;;  %s739_s12 = smov 0   ;;  %s741_s13 = smov 0  }
   0x8   :  { %s743_s14 = smov 0   ;;  %s745_s15 = smov 0  }
   0x9   :  { %s747_s16 = smov 0   ;;  %s749_s17 = smov 0  }
   0xa LB: > { %s447_s18 = sadd.s32 4294967295, %s713_s17   ;;  %s448_s19 = sadd.s32 4294967294, %s713_s17   ;;  %s713_s17 = sphi %s749_s17, %s26_s17   ;;  %s709_s16 = sphi %s747_s16, %s965_s16   ;;  %s705_s15 = sphi %s745_s15, %s964_s15   ;;  %s701_s14 = sphi %s743_s14, %s963_s14   ;;  %s697_s13 = sphi %s741_s13, %s962_s13   ;;  %s693_s12 = sphi %s739_s12, %s961_s12  }
   0xb   : > { %s38_s20 = sadd.s32 1, %s709_s16  ;;  %s47_s21 = sadd.s32 1, %s701_s14 }
   0xc   : > { %p40_p0 = scmp.ge.s32.totalorder %s38_s20, 2  ;;  %p54_p1 = scmp.ne.s32.totalorder %s701_s14, %s697_s13 }
   0xd   : > { %p55_p2 = scmp.eq.s32.totalorder %s713_s17, 0  ;;  %p60_p3 = scmp.ne.s32.totalorder %s697_s13, %s693_s12 }
   0xe   : > { %s967_s20 = smov (%p40_p0, %s38_s20), 0  ;;  %p61_p5 = scmp.eq.s32.totalorder %s447_s18, 0 }
   0xf   : > { %p780_p4 = por %p55_p2, %p54_p1  ;;  %s42_s23 = ssub.s32 %s709_s16, %s967_s20 }
  0x10   : > { %p114_p6 = scmp.eq.s32.totalorder %s447_s18, 1  ;;  %p45_p7 = scmp.eq.s32.totalorder %s42_s23, 0 }
  0x11   : > { %p786_p8 = por %p61_p5, %p60_p3  ;;  %p120_p10 = scmp.eq.s32.totalorder %s448_s19, 1 }
  0x12   : > { %p790_p9 = por %p114_p6, %p54_p1  ;;  %p488_p13 = scmp.lt.s32.totalorder %s713_s17, 2 }
  0x13   : > { %s795_s26 = scalar_select %p45_p7, %s701_s14, %s47_s21  }
  0x14   : > { %p797_p11 = por %p120_p10, %p60_p3  ;;  %s804_s28 = sand.u32 1, %s701_s14  }
  0x15   : > { %s451_s29 = sshll.u32 %s804_s28, 3  ;;  %s452_s30 = sshll.u32 %s709_s16, 7 }
  0x16   : > { %s176_s6 = scalar_lea.hbm %s950_s0, %s452_s30  ;;  %s170_s7 = scalar_lea.vmem [#allocation2], %s451_s29 }
  0x17   : > { %s178_s8 = sshll.u32 %s170_s7, 4  ;;  %p813_p0 = pnand %p488_p13, %p780_p4  ;;  %s179_s8 = int_to_ptr.vmem [resolvable:$true] %s178_s8 }
  0x18   : > { %p455_p1 = scmp.ge.s32.totalorder %s713_s17, 1  ;;  %p202_p2 = scmp.lt.s32.totalorder %s713_s17, 3 }
  0x19   : > { %s167_s10 = scalar_lea.sflag [#allocation3], %s804_s28  ;;  %p545_p3 = pneg %p813_p0 }
  0x1a   : > { %s556_s11 = scalar_lea.vmem %s179_s8, 128  ;;  %s715_s18 = smov [#allocation2]  }
  0x1b   : > { %p557_p5 = scmp.ne.s32.totalorder %s179_s8, %s556_s11  ;;  %s561_s19 = sshll.u32 %s715_s18, 4  ;;  %s562_s19 = int_to_ptr.vmem [resolvable:$false] %s561_s19 }
  0x1c   : > { %s563_s21 = scalar_lea.vmem %s562_s19, 256  ;;  %p564_p4 = scmp.lt.s32.totalorder %s179_s8, %s562_s19 }
  0x1d   : > { %p559_p6 = pnand %p557_p5, %p545_p3  ;;  %p565_p10 = scmp.lt.s32.totalorder %s563_s21, %s556_s11 }
  0x1f   : > { %p560_p7 = pneg %p559_p6  ;;  %p566_p13 = por %p565_p10, %p564_p4 }
  0x21   : > { %p567_p12 = pnand %p566_p13, %p560_p7 }
  0x23   : > { %570 = shalt.err (!%p567_p12)
}
  0x24   : > { %477 = dma.hbm_to_vmem [thread:$0]  (!%p813_p0), %s176_s6, 128, %s179_s8, %s167_s10  }
  0x25   : > { %p831_p5 = pnand %p455_p1, %p202_p2  ;;  %s195_s5 = scalar_lea.hbm %s951_s1, %s452_s30 }
  0x26   : > { %s189_s7 = scalar_lea.vmem [#allocation5], %s451_s29  ;;  %s186_s18 = scalar_lea.sflag [#allocation6], %s804_s28 }
  0x27   : > { %s197_s11 = sshll.u32 %s189_s7, 4  ;;  %s716_s6 = smov [#allocation5]   ;;  %s198_s11 = int_to_ptr.vmem [resolvable:$true] %s197_s11 }
  0x28   : > { %s584_s19 = scalar_lea.vmem %s198_s11, 128  ;;  %s589_s8 = sshll.u32 %s716_s6, 4  ;;  %s590_s8 = int_to_ptr.vmem [resolvable:$false] %s589_s8 }
  0x29   : > { %p585_p12 = scmp.ne.s32.totalorder %s198_s11, %s584_s19  ;;  %s591_s10 = scalar_lea.vmem %s590_s8, 256 }
  0x2a   : > { %p592_p1 = scmp.lt.s32.totalorder %s198_s11, %s590_s8  ;;  %p593_p2 = scmp.lt.s32.totalorder %s591_s10, %s584_s19 }
  0x2b   : > { %p587_p6 = pnand %p585_p12, %p545_p3 }
  0x2c   : > { %p594_p4 = por %p593_p2, %p592_p1 }
  0x2d   : > { %p588_p7 = pneg %p587_p6 }
  0x2f   : > { %p595_p10 = pnand %p594_p4, %p588_p7 }
  0x31   : > { %598 = shalt.err (!%p595_p10)
}
  0x32   : > { %480 = dma.hbm_to_vmem [thread:$0]  (!%p813_p0), %s195_s5, 128, %s198_s11, %s186_s18  }
  0x33   : > { %206 = sbr.rel (%p831_p5) target bundleno = 121 (0x79), region = 28  ;;  %s847_s28 = sand.u32 (!%p831_p5), 1, %s697_s13  }
  0x34   : > { %s850_s29 = sshll.u32 (!%p831_p5), %s847_s28, 3  ;;  %s209_s30 = scalar_lea.sflag (!%p831_p5), [#allocation3], %s847_s28 }
  0x35   : > { %s212_s21 = scalar_lea.vmem (!%p831_p5), [#allocation2], %s850_s29 }
  0x38   : > { %676 = dma.done.wait (%p786_p8), %s209_s30, 128  }
  0x39   : > { %678 = vsyncadd (%p786_p8), %s209_s30, 4294967168  ;;  %s218_s9 = scalar_lea.sflag [#allocation6], %s847_s28  ;;  %s221_s22 = scalar_lea.vmem [#allocation5], %s850_s29 }
  0x3a   : > { %680 = dma.done.wait (%p786_p8), %s218_s9, 128  }
  0x3b   : > { %682 = vsyncadd (%p786_p8), %s218_s9, 4294967168  ;;  %v259_v0 = vld [vmem:[%s212_s21] sm:$0xff]  ;;  %v260_v4 = vld [vmem:[%s221_s22] sm:$0xff]  ;;  %s246_s24 = scalar_lea.vmem [#allocation7], %s850_s29  ;;  %s462_s4 = sshll.u32 %s705_s15, 7 }
  0x3c   : > { %v261_v1 = vadd.f32 1e-12, %v259_v0  ;;  %v266_v2 = vsub.f32 1.0, %v259_v0  ;;  %v265_v7 = vsub.f32 1.0, %v260_v4  ;;  %s298_s23 = sshll.u32 %s246_s24, 4  ;;  %s253_s5 = scalar_lea.vmem [#allocation8], %s850_s29  ;;  %s869_s23 = int_to_ptr.vmem [resolvable:$true] %s298_s23 }
  0x3d   : > { %s311_s7 = sshll.u32 %s253_s5, 4  ;;  %s874_s19 = scalar_lea.hbm %s952_s2, %s462_s4  ;;  %s881_s7 = int_to_ptr.vmem [resolvable:$true] %s311_s7 }
  0x3e   : > { %539 = vlog2.f32 %v261_v1  ;;  %v267_v3 = vadd.f32 1e-12, %v266_v2  ;;  %s879_s15 = scalar_lea.hbm %s953_s3, %s462_s4  ;;  %s279_s10 = scalar_lea.sflag [#allocation4], %s847_s28 }
  0x3f   : > { %s599_s30 = scalar_lea.vmem %s869_s23, 128  ;;  %s717_s21 = smov [#allocation7]  }
  0x40   : > { %541 = vlog2.f32 %v267_v3  ;;  %p600_p8 = scmp.ne.s32.totalorder %s869_s23, %s599_s30  ;;  %s603_s9 = sshll.u32 %s717_s21, 4  ;;  %s604_s9 = int_to_ptr.vmem [resolvable:$false] %s603_s9 }
  0x41   : > { %s605_s22 = scalar_lea.vmem %s604_s9, 256  ;;  %p606_p13 = scmp.lt.s32.totalorder %s869_s23, %s604_s9 }
  0x42   : > { %p601_p0 = pnand %p600_p8, %p790_p9  ;;  %p607_p5 = scmp.lt.s32.totalorder %s605_s22, %s599_s30 }
  0x44   : > { %p602_p3 = pneg %p601_p0  ;;  %p608_p12 = por %p607_p5, %p606_p13 }
  0x46   : > { %p609_p6 = pnand %p608_p12, %p602_p3 }
  0x4b   : > { %v540_v5 = vpop.eup %539 }
  0x4c   : > { %v263_v6 = vmul.f32 0.6931472, %v540_v5 }
  0x4d   : > { %v542_v8 = vpop.eup %541 }
  0x4e   : > { %v264_v9 = vmul.f32 %v263_v6, %v260_v4  ;;  %v269_v10 = vmul.f32 0.6931472, %v542_v8 }
  0x50   : > { %v270_v11 = vmul.f32 %v269_v10, %v265_v7 }
  0x52   : > { %v271_v12 = vadd.f32 %v270_v11, %v264_v9 }
  0x54   : > { %v272_v13 = vsub.f32 0.0, %v271_v12 }
  0x56   : > { %273 = vst [vmem:[%s246_s24] sm:$0xff] %v272_v13 }
  0x57   : > { %612 = shalt.err (!%p609_p6)
}
  0x58   : > { %s613_s24 = scalar_lea.hbm %s874_s19, 128  ;;  %s617_s18 = scalar_lea.hbm %s952_s2, 256 }
  0x59   : > { %p614_p7 = scmp.ne.s32.totalorder %s874_s19, %s613_s24  ;;  %p618_p4 = scmp.lt.s32.totalorder %s874_s19, %s952_s2 }
  0x5a   : > { %p619_p10 = scmp.lt.s32.totalorder %s617_s18, %s613_s24 }
  0x5b   : > { %p615_p1 = pnand %p614_p7, %p790_p9 }
  0x5c   : > { %p620_p8 = por %p619_p10, %p618_p4 }
  0x5d   : > { %p616_p2 = pneg %p615_p1 }
  0x5f   : > { %p621_p0 = pnand %p620_p8, %p616_p2 }
  0x61   : > { %624 = shalt.err (!%p621_p0)
}
  0x62   : > { %470 = dma.vmem_to_hbm [thread:$0]  (%p790_p9), %s869_s23, 128, %s874_s19, %s279_s10   ;;  %277 = vst [vmem:[%s253_s5] sm:$0xff] %v272_v13 }
  0x63   : > { %s284_s30 = scalar_lea.sflag [#allocation9], %s847_s28  ;;  %s625_s21 = scalar_lea.vmem %s881_s7, 128 }
  0x64   : > { %p626_p3 = scmp.ne.s32.totalorder %s881_s7, %s625_s21  ;;  %s718_s9 = smov [#allocation8]  }
  0x65   : > { %s629_s22 = sshll.u32 %s718_s9, 4  ;;  %s630_s22 = int_to_ptr.vmem [resolvable:$false] %s629_s22 }
  0x66   : > { %p627_p13 = pnand %p626_p3, %p790_p9  ;;  %s631_s24 = scalar_lea.vmem %s630_s22, 256 }
  0x67   : > { %p632_p12 = scmp.lt.s32.totalorder %s881_s7, %s630_s22  ;;  %p633_p6 = scmp.lt.s32.totalorder %s631_s24, %s625_s21 }
  0x68   : > { %p628_p5 = pneg %p627_p13 }
  0x69   : > { %p634_p7 = por %p633_p6, %p632_p12 }
  0x6b   : > { %p635_p1 = pnand %p634_p7, %p628_p5 }
  0x6d   : > { %638 = shalt.err (!%p635_p1)
}
  0x6e   : > { %s639_s29 = scalar_lea.hbm %s879_s15, 128  ;;  %s643_s5 = scalar_lea.hbm %s953_s3, 256 }
  0x6f   : > { %p640_p2 = scmp.ne.s32.totalorder %s879_s15, %s639_s29  ;;  %p644_p8 = scmp.lt.s32.totalorder %s879_s15, %s953_s3 }
  0x70   : > { %p645_p0 = scmp.lt.s32.totalorder %s643_s5, %s639_s29 }
  0x71   : > { %p641_p4 = pnand %p640_p2, %p790_p9 }
  0x72   : > { %p646_p3 = por %p645_p0, %p644_p8 }
  0x73   : > { %p642_p10 = pneg %p641_p4 }
  0x75   : > { %p647_p13 = pnand %p646_p3, %p642_p10 }
  0x77   : > { %650 = shalt.err (!%p647_p13)
}
  0x78   : > { %471 = dma.vmem_to_hbm [thread:$0]  (%p790_p9), %s881_s7, 128, %s879_s15, %s284_s30  }
  0x79 PF: > { %s323_s4 = sand.u32 1, %s693_s12   ;;  %p960_p5 = scmp.ge.s32.totalorder %s713_s17, 2 }
  0x7a   : > { %s324_s11 = scalar_lea.sflag [#allocation4], %s323_s4 }
  0x7b   : > { %p482_p12 = pnand %p960_p5, %p797_p11 }
  0x7d   : > { %p483_p6 = pneg %p482_p12 }
  0x7f   : > { %684 = dma.done.wait (%p483_p6), %s324_s11, 128  }
  0x80   : > { %686 = vsyncadd (%p483_p6), %s324_s11, 4294967168  ;;  %s333_s18 = scalar_lea.sflag [#allocation9], %s323_s4 }
  0x81   : > { %688 = dma.done.wait (%p483_p6), %s333_s18, 128  }
  0x82   : > { %690 = vsyncadd (%p483_p6), %s333_s18, 4294967168  ;;  %s26_s17 = sadd.s32 1, %s713_s17   ;;  %s961_s12 = smov %s697_s13 }
  0x83   : > { %p23_p7 = scmp.ge.s32.totalorder %s26_s17, 4   ;;  %s962_s13 = smov %s701_s14 }
  0x84   : > { %s963_s14 = smov %s795_s26  ;;  %s964_s15 = smov %s709_s16 }
  0x85   : > { %s965_s16 = smov %s967_s20  ;;  %25 = sbr.rel (!%p23_p7) target bundleno = 10 (0xa), region = 107 }
  0x8a   :  { %338 = vsyncpa [#allocation3], 1 }
  0x8b   :  { %340 = vsyncpa [#allocation3 + $0x1], 1 }
  0x8c   :  { %341 = vsyncpa [#allocation6], 1 }
  0x8d   :  { %343 = vsyncpa [#allocation6 + $0x1], 1 }
  0x8e   :  { %344 = vsyncpa [#allocation4], 1 }
  0x8f   :  { %346 = vsyncpa [#allocation4 + $0x1], 1 }
  0x90   :  { %347 = vsyncpa [#allocation9], 1 }
  0x91   :  { %349 = vsyncpa [#allocation9 + $0x1], 1 }

</bundles_post_ra>
